<compile_context>
chip_gen: v6e
topology: v6e:2x2x1
jax: 0.10.0
libtpu: 0.0.40
codegen_flags: <defaults>
</compile_context>

<pallas_src>
import functools

import jax
import jax.numpy as jnp
from jax.experimental import pallas as pl
from jax.experimental.pallas import tpu as pltpu


def _round_up(n, m):
    return ((n + m - 1) // m) * m


def _choose_tb(B, din):
    """Batch-tile size: multiple of 8, minimal zero-row waste, v7x-friendly."""
    b8 = _round_up(B, 8)
    # Cap TB so the double-buffered f32 input tile stays <= ~4 MiB and TB <= 2048 (v7x VMEM).
    cap = max(8, min(2048, (4 << 20) // max(1, din * 4 * 2)))
    cap = (cap // 8) * 8
    if b8 <= 2 * cap:
        if b8 <= 64:
            return b8                                    # tiny batch: single tile
        # split into 2 tiles so the batch axis can shard across v7x's 2 TensorCores
        return max(8, _round_up((b8 + 1) // 2, 8))
    # Large rollout batches: pick TB minimizing round-up waste (tie-break: larger tile).
    best_tb, best_waste = None, None
    for tb in (512, 1024, 2048):
        if tb > cap:
            continue
        bp = _round_up(b8, tb)
        waste = bp - b8
        if best_waste is None or waste < best_waste or (waste == best_waste and tb > best_tb):
            best_tb, best_waste = tb, waste
    return best_tb if best_tb is not None else cap


def _ppo_kernel(x_ref, w1_ref, b1_ref, w2_ref, b2_ref, wh_ref, bh_ref, out_ref):
    """Fused MLP: two hidden layers (ReLU) + fused actor/critic head.

    x_ref:  (TB, din)    f32  (cast to bf16 in-kernel, hidden under MXU/DMA)
    w1_ref: (din, 256)   bf16   b1_ref: (1, 256) f32
    w2_ref: (256, 128)   bf16   b2_ref: (1, 128) f32
    wh_ref: (128, OUT_P) bf16   bh_ref: (1, OUT_P) f32  (actor cols 0..A-1, critic col A)
    out_ref:(TB, OUT_P)  bf16   lane-dense unmasked store
    """
    x = x_ref[...].astype(jnp.bfloat16)

    h1 = jnp.dot(x, w1_ref[...], preferred_element_type=jnp.float32)
    h1 = jnp.maximum(h1 + b1_ref[...], 0.0)          # f32 bias/ReLU on VPU (v5e-safe)
    h1 = h1.astype(jnp.bfloat16)                     # bf16 operand for next MXU push

    h2 = jnp.dot(h1, w2_ref[...], preferred_element_type=jnp.float32)
    h2 = jnp.maximum(h2 + b2_ref[...], 0.0)
    h2 = h2.astype(jnp.bfloat16)

    out = jnp.dot(h2, wh_ref[...], preferred_element_type=jnp.float32) + bh_ref[...]
    out_ref[...] = out.astype(out_ref.dtype)


def prepare_params(params):
    """One-time weight prep per parameter update (NOT per forward call).

    Fuses actor+critic heads into one lane-dense (128, OUT_P) matrix and casts MXU
    operands to bf16; biases stay f32. Returns (prepared_dict, num_actions).
    """
    f32, bf16 = jnp.float32, jnp.bfloat16
    A = params["wa"].shape[1]
    H1 = params["w1"].shape[1]                       # 256
    H2 = params["w2"].shape[1]                       # 128
    OUT_P = _round_up(max(A + 1, 128), 128)          # fused actor+critic head, lane-dense

    w1 = params["w1"].astype(bf16)                   # (din, 256) -- unpadded
    w2 = params["w2"].astype(bf16)                   # (256, 128)
    wh = jnp.zeros((H2, OUT_P), f32)
    wh = wh.at[:, :A].set(params["wa"]).at[:, A:A + 1].set(params["wc"]).astype(bf16)

    b1 = params["b1"].reshape(1, H1).astype(f32)
    b2 = params["b2"].reshape(1, H2).astype(f32)
    bh = jnp.zeros((1, OUT_P), f32)
    bh = bh.at[:, :A].set(params["ba"].reshape(1, A))
    bh = bh.at[:, A:A + 1].set(params["bc"].reshape(1, 1))

    prep = dict(w1=w1, b1=b1, w2=w2, b2=b2, wh=wh, bh=bh)
    return prep, A


@jax.jit
def ppo_forward_packed(x, prep):
    """x: (B, height, width, depth) f32; prep: output of prepare_params()[0].

    Returns the packed padded head output (Bp, OUT_P) in bf16:
      cols [0, A)   = actor logits
      col  A        = critic value
      remaining cols / rows >= B are zero padding.
    """
    B = x.shape[0]
    x_flat = x.reshape(B, -1)                        # nn.Flatten
    din = x_flat.shape[1]
    H1 = prep["w1"].shape[1]
    H2 = prep["w2"].shape[1]
    OUT_P = prep["wh"].shape[1]

    TB = _choose_tb(B, din)
    Bp = _round_up(B, TB)
    if Bp != B:
        x_flat = jnp.pad(x_flat, ((0, Bp - B), (0, 0)))   # only pass over x (f32, unpadded din)

    grid = (Bp // TB,)

    flops = 2 * Bp * (din * H1 + H1 * H2 + H2 * OUT_P)
    weight_bytes = ((prep["w1"].size + prep["w2"].size + prep["wh"].size) * 2
                    + (prep["b1"].size + prep["b2"].size + prep["bh"].size) * 4)
    bytes_accessed = (Bp * din * 4                   # f32 input read
                      + weight_bytes
                      + Bp * OUT_P * 2)              # bf16 output write

    # VMEM budget: double-buffered x/out tiles + h1/h2 intermediates + resident weights.
    vmem_bytes = (2 * TB * din * 4
                  + 2 * TB * OUT_P * 2
                  + TB * H1 * (4 + 2)
                  + TB * H2 * (4 + 2)
                  + TB * OUT_P * 4
                  + weight_bytes
                  + (2 << 20))                       # headroom
    vmem_limit = int(min(max(vmem_bytes, 4 << 20), 32 << 20))

    out = pl.pallas_call(
        _ppo_kernel,
        out_shape=jax.ShapeDtypeStruct((Bp, OUT_P), jnp.bfloat16),
        grid=grid,
        in_specs=[
            pl.BlockSpec((TB, din), lambda i: (i, 0)),   # x: tiled over batch, unpadded din
            pl.BlockSpec((din, H1), lambda i: (0, 0)),   # weights/biases: VMEM-resident
            pl.BlockSpec((1, H1), lambda i: (0, 0)),
            pl.BlockSpec((H1, H2), lambda i: (0, 0)),
            pl.BlockSpec((1, H2), lambda i: (0, 0)),
            pl.BlockSpec((H2, OUT_P), lambda i: (0, 0)),
            pl.BlockSpec((1, OUT_P), lambda i: (0, 0)),
        ],
        out_specs=pl.BlockSpec((TB, OUT_P), lambda i: (i, 0)),
        compiler_params=pltpu.CompilerParams(
            dimension_semantics=("parallel",),
            vmem_limit_bytes=vmem_limit),
        cost_estimate=pl.CostEstimate(
            flops=flops, transcendentals=0, bytes_accessed=bytes_accessed),
    )(x_flat, prep["w1"], prep["b1"], prep["w2"], prep["b2"], prep["wh"], prep["bh"])
    return out


def ppo_actor_critic_forward(x, prep, num_actions):
    """Convenience wrapper matching the PyTorch API: returns (actor (B,A), critic (B,1)) f32.

    Slicing happens lazily at the consumer (outside the jitted hot path).
    """
    out = ppo_forward_packed(x, prep)
    B = x.shape[0]
    actor = out[:B, :num_actions].astype(jnp.float32)
    critic = out[:B, num_actions:num_actions + 1].astype(jnp.float32)
    return actor, critic


def init_params(key, input_size, num_actions):
    """Deterministic synthetic init (shapes match the PyTorch module)."""
    ks = jax.random.split(key, 8)

    def lin(kw, kb, fan_in, fan_out):
        # PyTorch Linear default: U(-1/sqrt(fan_in), 1/sqrt(fan_in))
        bound = 1.0 / jnp.sqrt(jnp.float32(fan_in))
        w = jax.random.uniform(kw, (fan_in, fan_out), jnp.float32, -bound, bound)
        b = jax.random.uniform(kb, (1, fan_out), jnp.float32, -bound, bound)
        return w, b

    w1, b1 = lin(ks[0], ks[1], input_size, 256)
    w2, b2 = lin(ks[2], ks[3], 256, 128)
    wa, ba = lin(ks[4], ks[5], 128, num_actions)
    wc, bc = lin(ks[6], ks[7], 128, 1)
    return dict(w1=w1, b1=b1, w2=w2, b2=b2, wa=wa, ba=ba, wc=wc, bc=bc)


def reference_forward_bf16(x_flat, p):
    """Same math as the kernel (bf16 MXU operands, f32 accumulate / elementwise)."""
    bf16, f32 = jnp.bfloat16, jnp.float32
    h1 = jnp.dot(x_flat.astype(bf16), p["w1"].astype(bf16), preferred_element_type=f32)
    h1 = jnp.maximum(h1 + p["b1"], 0.0).astype(bf16)
    h2 = jnp.dot(h1, p["w2"].astype(bf16), preferred_element_type=f32)
    h2 = jnp.maximum(h2 + p["b2"], 0.0).astype(bf16)
    actor = jnp.dot(h2, p["wa"].astype(bf16), preferred_element_type=f32) + p["ba"]
    critic = jnp.dot(h2, p["wc"].astype(bf16), preferred_element_type=f32) + p["bc"]
    return actor, critic


def reference_forward_f32(x_flat, p):
    h1 = jnp.maximum(x_flat @ p["w1"] + p["b1"], 0.0)
    h2 = jnp.maximum(h1 @ p["w2"] + p["b2"], 0.0)
    return h2 @ p["wa"] + p["ba"], h2 @ p["wc"] + p["bc"]


if __name__ == "__main__":
    # Small shapes consistent with the module: height=4, width=4, depth=2.
    height, width, depth = 4, 4, 2
    num_actions = depth * width            # = 8 (matches self.num_actions)
    batch = 2
    input_size = height * width * depth    # = 32

    key = jax.random.PRNGKey(0)
    kx, kp = jax.random.split(key)

    x = jax.random.normal(kx, (batch, height, width, depth), jnp.float32)
    params = init_params(kp, input_size, num_actions)

    # Weight prep is hoisted out of the per-step forward: done once per parameter update.
    prep, A = prepare_params(params)

    actor, critic = ppo_actor_critic_forward(x, prep, A)
    jax.block_until_ready((actor, critic))

    # Correctness: exact-semantics bf16 reference (tight, modulo bf16 output store)
    # + f32 reference (loose).
    x_flat = x.reshape(batch, input_size)
    ra_bf, rc_bf = reference_forward_bf16(x_flat, params)
    ra_f32, rc_f32 = reference_forward_f32(x_flat, params)

    assert actor.shape == (batch, num_actions)
    assert critic.shape == (batch, 1)
    # Kernel stores the head in bf16, so allow bf16-rounding slack vs. the f32-stored reference.
    assert jnp.allclose(actor, ra_bf, atol=2e-2, rtol=2e-2)
    assert jnp.allclose(critic, rc_bf, atol=2e-2, rtol=2e-2)
    assert jnp.allclose(actor, ra_f32, atol=1e-1, rtol=1e-1)
    assert jnp.allclose(critic, rc_f32, atol=1e-1, rtol=1e-1)

    print("KERNEL_OK")
</pallas_src>

<mosaic_0001>
module attributes {stable_mosaic.version = 11 : i64} {
  func.func @_ppo_kernel(%arg0: i32, %arg1: memref<8x32xf32, #tpu.memory_space<vmem>>, %arg2: memref<32x256xbf16, #tpu.memory_space<vmem>>, %arg3: memref<1x256xf32, #tpu.memory_space<vmem>>, %arg4: memref<256x128xbf16, #tpu.memory_space<vmem>>, %arg5: memref<1x128xf32, #tpu.memory_space<vmem>>, %arg6: memref<128x128xbf16, #tpu.memory_space<vmem>>, %arg7: memref<1x128xf32, #tpu.memory_space<vmem>>, %arg8: memref<8x128xbf16, #tpu.memory_space<vmem>>) attributes {dimension_semantics = [#tpu.dimension_semantics<parallel>], iteration_bounds = array<i64: 1>, scalar_prefetch = 0 : i64, scratch_operands = 0 : i64, tpu.core_type = #tpu.core_type<tc>, window_params = [{transform_indices = @transform_0, window_bounds = array<i64: 8, 32>}, {pipeline_mode = #tpu.pipeline_mode<synchronous>, transform_indices = @transform_1, window_bounds = array<i64: 32, 256>}, {pipeline_mode = #tpu.pipeline_mode<synchronous>, transform_indices = @transform_2, window_bounds = array<i64: 1, 256>}, {pipeline_mode = #tpu.pipeline_mode<synchronous>, transform_indices = @transform_3, window_bounds = array<i64: 256, 128>}, {pipeline_mode = #tpu.pipeline_mode<synchronous>, transform_indices = @transform_4, window_bounds = array<i64: 1, 128>}, {pipeline_mode = #tpu.pipeline_mode<synchronous>, transform_indices = @transform_5, window_bounds = array<i64: 128, 128>}, {pipeline_mode = #tpu.pipeline_mode<synchronous>, transform_indices = @transform_6, window_bounds = array<i64: 1, 128>}, {transform_indices = @transform_7, window_bounds = array<i64: 8, 128>}]} {
    %c0 = arith.constant 0 : index
    %c0_0 = arith.constant 0 : index
    %0 = vector.load %arg1[%c0, %c0_0] : memref<8x32xf32, #tpu.memory_space<vmem>>, vector<8x32xf32>
    %1 = arith.truncf %0 : vector<8x32xf32> to vector<8x32xbf16>
    %c0_1 = arith.constant 0 : index
    %c0_2 = arith.constant 0 : index
    %2 = vector.load %arg2[%c0_1, %c0_2] : memref<32x256xbf16, #tpu.memory_space<vmem>>, vector<32x256xbf16>
    %cst = arith.constant dense<0.000000e+00> : vector<8x256xf32>
    %3 = tpu.matmul %1, %2, %cst {dimension_numbers = #tpu.dot_dimension_numbers<[1], [0], [0], [1], [0, 0, 1, 1], [], []>} : vector<8x32xbf16>, vector<32x256xbf16>, vector<8x256xf32> -> vector<8x256xf32>
    %c0_3 = arith.constant 0 : index
    %c0_4 = arith.constant 0 : index
    %4 = vector.load %arg3[%c0_3, %c0_4] : memref<1x256xf32, #tpu.memory_space<vmem>>, vector<1x256xf32>
    %5 = vector.broadcast %4 : vector<1x256xf32> to vector<8x256xf32>
    %6 = arith.addf %3, %5 : vector<8x256xf32>
    %cst_5 = arith.constant 0.000000e+00 : f32
    %7 = vector.broadcast %cst_5 : f32 to vector<8x256xf32>
    %8 = arith.maximumf %6, %7 : vector<8x256xf32>
    %9 = arith.truncf %8 : vector<8x256xf32> to vector<8x256xbf16>
    %c0_6 = arith.constant 0 : index
    %c0_7 = arith.constant 0 : index
    %10 = vector.load %arg4[%c0_6, %c0_7] : memref<256x128xbf16, #tpu.memory_space<vmem>>, vector<256x128xbf16>
    %cst_8 = arith.constant dense<0.000000e+00> : vector<8x128xf32>
    %11 = tpu.matmul %9, %10, %cst_8 {dimension_numbers = #tpu.dot_dimension_numbers<[1], [0], [0], [1], [0, 0, 1, 1], [], []>} : vector<8x256xbf16>, vector<256x128xbf16>, vector<8x128xf32> -> vector<8x128xf32>
    %c0_9 = arith.constant 0 : index
    %c0_10 = arith.constant 0 : index
    %12 = vector.load %arg5[%c0_9, %c0_10] : memref<1x128xf32, #tpu.memory_space<vmem>>, vector<1x128xf32>
    %13 = vector.broadcast %12 : vector<1x128xf32> to vector<8x128xf32>
    %14 = arith.addf %11, %13 : vector<8x128xf32>
    %cst_11 = arith.constant 0.000000e+00 : f32
    %15 = vector.broadcast %cst_11 : f32 to vector<8x128xf32>
    %16 = arith.maximumf %14, %15 : vector<8x128xf32>
    %17 = arith.truncf %16 : vector<8x128xf32> to vector<8x128xbf16>
    %c0_12 = arith.constant 0 : index
    %c0_13 = arith.constant 0 : index
    %18 = vector.load %arg6[%c0_12, %c0_13] : memref<128x128xbf16, #tpu.memory_space<vmem>>, vector<128x128xbf16>
    %cst_14 = arith.constant dense<0.000000e+00> : vector<8x128xf32>
    %19 = tpu.matmul %17, %18, %cst_14 {dimension_numbers = #tpu.dot_dimension_numbers<[1], [0], [0], [1], [0, 0, 1, 1], [], []>} : vector<8x128xbf16>, vector<128x128xbf16>, vector<8x128xf32> -> vector<8x128xf32>
    %c0_15 = arith.constant 0 : index
    %c0_16 = arith.constant 0 : index
    %20 = vector.load %arg7[%c0_15, %c0_16] : memref<1x128xf32, #tpu.memory_space<vmem>>, vector<1x128xf32>
    %21 = vector.broadcast %20 : vector<1x128xf32> to vector<8x128xf32>
    %22 = arith.addf %19, %21 : vector<8x128xf32>
    %23 = arith.truncf %22 : vector<8x128xf32> to vector<8x128xbf16>
    %c0_17 = arith.constant 0 : index
    %c0_18 = arith.constant 0 : index
    %24 = vector.load %arg8[%c0_17, %c0_18] : memref<8x128xbf16, #tpu.memory_space<vmem>>, vector<8x128xbf16>
    tpu.vector_store %arg8[%c0_17, %c0_18], %23 {strides = array<i32>} : memref<8x128xbf16, #tpu.memory_space<vmem>>, vector<8x128xbf16>,
    return
  }
  func.func @transform_0(%arg0: i32) -> (i32, i32) {
    %c0_i32 = arith.constant 0 : i32
    %c0_i32_0 = arith.constant 0 : i32
    return %arg0, %c0_i32 : i32, i32
  }
  func.func @transform_1(%arg0: i32) -> (i32, i32) {
    %c0_i32 = arith.constant 0 : i32
    %c0_i32_0 = arith.constant 0 : i32
    %c0_i32_1 = arith.constant 0 : i32
    return %c0_i32, %c0_i32_0 : i32, i32
  }
  func.func @transform_2(%arg0: i32) -> (i32, i32) {
    %c0_i32 = arith.constant 0 : i32
    %c0_i32_0 = arith.constant 0 : i32
    %c0_i32_1 = arith.constant 0 : i32
    return %c0_i32, %c0_i32_0 : i32, i32
  }
  func.func @transform_3(%arg0: i32) -> (i32, i32) {
    %c0_i32 = arith.constant 0 : i32
    %c0_i32_0 = arith.constant 0 : i32
    %c0_i32_1 = arith.constant 0 : i32
    return %c0_i32, %c0_i32_0 : i32, i32
  }
  func.func @transform_4(%arg0: i32) -> (i32, i32) {
    %c0_i32 = arith.constant 0 : i32
    %c0_i32_0 = arith.constant 0 : i32
    %c0_i32_1 = arith.constant 0 : i32
    return %c0_i32, %c0_i32_0 : i32, i32
  }
  func.func @transform_5(%arg0: i32) -> (i32, i32) {
    %c0_i32 = arith.constant 0 : i32
    %c0_i32_0 = arith.constant 0 : i32
    %c0_i32_1 = arith.constant 0 : i32
    return %c0_i32, %c0_i32_0 : i32, i32
  }
  func.func @transform_6(%arg0: i32) -> (i32, i32) {
    %c0_i32 = arith.constant 0 : i32
    %c0_i32_0 = arith.constant 0 : i32
    %c0_i32_1 = arith.constant 0 : i32
    return %c0_i32, %c0_i32_0 : i32, i32
  }
  func.func @transform_7(%arg0: i32) -> (i32, i32) {
    %c0_i32 = arith.constant 0 : i32
    %c0_i32_0 = arith.constant 0 : i32
    return %arg0, %c0_i32 : i32, i32
  }
}

</mosaic_0001>

<bundles_post_ra>
// kernel: ppo_forward_packed.1
= control target key start
LH: loop header
LB: loop body
LE: loop exit
PB: predicated region body
PF: predicated region fallthrough
CT: control target
= control target key end

     0   :  { %12 = vsyncpa [#allocation3], 0  ;;  %s698_s0 = inlined_call_operand.vmem [shape: f32[8,32], index: 0, kind: input, shape index: {}]   ;;  %s699_s1 = inlined_call_operand.vmem [shape: bf16[32,256], index: 1, kind: input, shape index: {}]   ;;  %s700_s2 = inlined_call_operand.vmem [shape: f32[1,256], index: 2, kind: input, shape index: {}]   ;;  %s701_s3 = inlined_call_operand.hbm [shape: bf16[256,128], index: 3, kind: input, shape index: {}]   ;;  %s702_s4 = inlined_call_operand.vmem [shape: f32[1,128], index: 4, kind: input, shape index: {}]   ;;  %s703_s5 = inlined_call_operand.vmem [shape: bf16[128,128], index: 5, kind: input, shape index: {}]   ;;  %s704_s6 = inlined_call_operand.vmem [shape: f32[1,128], index: 6, kind: input, shape index: {}]   ;;  %s705_s7 = inlined_call_operand.hbm [shape: bf16[8,128], index: 7, kind: output, shape index: {}]  }
   0x1   :  { %13 = vsyncpa [#allocation4], 0  ;;  %s597_s24 = smov [#allocation2]  }
   0x2   :  { %s25_s25 = sshll.u32 %s597_s24, 4  ;;  %s26_s25 = int_to_ptr.vmem [resolvable:$true] %s25_s25 }
   0x3   :  { %s561_s26 = scalar_lea.vmem %s26_s25, 2048  ;;  %p566_p1 = scmp.lt.s32.totalorder %s26_s25, %s26_s25 }
   0x4   :  { %p562_p0 = scmp.ne.s32.totalorder %s26_s25, %s561_s26  ;;  %p567_p2 = scmp.lt.s32.totalorder %s561_s26, %s561_s26 }
   0x6   :  { %p568_p3 = por %p567_p2, %p566_p1 }
   0x8   :  { %p569_p4 = pnand %p568_p3, %p562_p0 }
   0xa   :  { %572 = shalt.err (!%p569_p4)
}
   0xb   :  { %s598_s27 = smov 64   ;;  %s599_s28 = smov 4  }
   0xc   :  { %31 = dma.hbm_to_vmem [thread:$0]  %s701_s3, 2048, %s26_s25, [#allocation3], %s598_s27, %s598_s27, %s599_s28  }
   0xd   :  { %593 = dma.done.wait [#allocation3], 2048  }
   0xe   :  { %594 = vsyncadd [#allocation3], 4294965248  ;;  %v600_v0 = vmov 0   ;;  %v523_v1 = vld [vmem:[%s699_s1 + $0x14] ss:$8 sps:$4 sm:$0xff]   ;;  %v42_v5 = vld [vmem:[%s698_s0] sm:$0xff]  ;;  %v50_v29 = vlaneseq }
   0xf   :  { %116 = vmatprep.mubr.bf16.mxu0 %v600_v0  ;;  %v525_v2 = vld [vmem:[%s699_s1 + $0x10] ss:$8 sps:$4 sm:$0xff]   ;;  %96 = vmatprep.subr.bf16.mxu0 %v523_v1  ;;  %v526_v3 = vld [vmem:[%s699_s1 + $0x4] ss:$8 sps:$4 sm:$0xff]   ;;  %v528_v4 = vld [vmem:[%s699_s1] ss:$8 sps:$4 sm:$0xff]   ;;  %v43_v9 = vpack.c.bf16 %v42_v5, %v42_v5 }
  0x10   :  { %97 = vmatpush1.bf16.msra.mxu0 %v525_v2  ;;  %v529_v6 = vld [vmem:[#allocation2 + $0x78] sm:$0xff]   ;;  %v531_v8 = vld [vmem:[#allocation2 + $0x70] sm:$0xff]   ;;  %vm80_vm0 = vcmask 261120   ;;  %v533_v11 = vld [vmem:[#allocation2 + $0x68] sm:$0xff]   ;;  %v601_v24 = vmov 0.0   ;;  %v51_v30 = vshrl.u32 %v50_v29, 7 }
  0x11   :  { %98 = vmatprep.subr.bf16.mxu0 %v526_v3  ;;  %v530_v7 = vld [vmem:[#allocation2 + $0x38] sm:$0xff]   ;;  %465 = vmatprep.subr.bf16.mxu1 %v529_v6  ;;  %v532_v10 = vld [vmem:[#allocation2 + $0x30] sm:$0xff]   ;;  %v534_v12 = vld [vmem:[#allocation2 + $0x28] sm:$0xff]   ;;  %vm602_vm1 = vmmov 0  }
  0x12   :  { %466 = vmatpush3.bf16.msra.mxu1 %v530_v7  ;;  %v535_v13 = vld [vmem:[#allocation2 + $0x60] sm:$0xff]   ;;  %v537_v15 = vld [vmem:[#allocation2 + $0x58] sm:$0xff]   ;;  %v539_v17 = vld [vmem:[#allocation2 + $0x50] sm:$0xff]   ;;  %v52_v31 = vsub.s32 0, %v51_v30  ;;  %v56_v33 = vsub.s32 1, %v51_v30 }
  0x13   :  { %467 = vmatprep.subr.bf16.mxu1 %v531_v8  ;;  %v536_v14 = vld [vmem:[#allocation2 + $0x20] sm:$0xff]   ;;  %v538_v16 = vld [vmem:[#allocation2 + $0x18] sm:$0xff]   ;;  %v540_v18 = vld [vmem:[#allocation2 + $0x10] sm:$0xff]  }
  0x14   :  { %99 = vmatpush1.bf16.msra.mxu0 %v528_v4  ;;  %v541_v19 = vld [vmem:[#allocation2 + $0x48] sm:$0xff]   ;;  %v543_v21 = vld [vmem:[#allocation2 + $0x40] sm:$0xff]   ;;  %v545_v23 = vld [vmem:[%s703_s5 + $0x38] sm:$0xff]  }
  0x15   :  { %v542_v20 = vld [vmem:[#allocation2 + $0x8] sm:$0xff]   ;;  %v544_v22 = vld [vmem:[#allocation2] sm:$0xff]   ;;  %496 = vmatprep.subr.bf16.mxu0 %v601_v24  ;;  %v546_v25 = vld [vmem:[%s703_s5 + $0x30] sm:$0xff]  }
  0x16   :  { %468 = vmatpush3.bf16.msra.mxu1 %v532_v10  ;;  %v547_v26 = vld [vmem:[%s703_s5 + $0x28] sm:$0xff]   ;;  %v548_v27 = vld [vmem:[%s703_s5 + $0x20] sm:$0xff]   ;;  %v549_v28 = vld [vmem:[%s703_s5 + $0x18] sm:$0xff]  }
  0x17   :  { %438 = vmatmul.mubr.msk.bf16.vlgmr.msra.gmra.mxu0 %vm80_vm0, %v43_v9  ;;  %469 = vmatprep.subr.bf16.mxu1 %v533_v11  ;;  %v48_v32 = vld [vmem:[%s700_s2] sm:$0x3]  ;;  %v550_v46 = vld [vmem:[%s703_s5 + $0x10] sm:$0xff]   ;;  %v551_v47 = vld [vmem:[%s703_s5 + $0x8] sm:$0xff]  }
  0x18   :  { %497 = vmatpush3.bf16.msra.mxu0 %v545_v23  ;;  %v53_v34 = vrot.slane %v48_v32, %v52_v31  ;;  %v57_v35 = vrot.slane %v48_v32, %v56_v33  ;;  %v552_v48 = vld [vmem:[%s703_s5] sm:$0xff]   ;;  %512 = vmatprep.mubr.msk.bf16.mxu0 %vm602_vm1, %v601_v24  ;;  %s603_s5 = smov [#allocation5]  }
  0x19   :  { %498 = vmatprep.subr.bf16.mxu0 %v601_v24  ;;  %v439_v50 = vld [vmem:[%s702_s4] ss:$0 sm:$0xff]  ;;  %s425_s13 = sshll.u32 %s603_s5, 4  ;;  %s426_s13 = int_to_ptr.vmem [resolvable:$true] %s425_s13 }
  0x1a   :  { %470 = vmatpush3.bf16.msra.mxu1 %v534_v12  ;;  %v456_v58 = vld [vmem:[%s704_s6] ss:$0 sm:$0xff]  ;;  %s573_s4 = scalar_lea.vmem %s426_s13, 64  ;;  %p578_p6 = scmp.lt.s32.totalorder %s426_s13, %s426_s13 }
  0x1b   :  { %471 = vmatprep.subr.bf16.mxu1 %v535_v13  ;;  %p574_p5 = scmp.ne.s32.totalorder %s426_s13, %s573_s4  ;;  %p579_p7 = scmp.lt.s32.totalorder %s573_s4, %s573_s4 }
  0x1c   :  { %499 = vmatpush3.bf16.msra.mxu0 %v546_v25 }
  0x1d   :  { %500 = vmatprep.subr.bf16.mxu0 %v601_v24  ;;  %p580_p8 = por %p579_p7, %p578_p6 }
  0x1e   :  { %472 = vmatpush3.bf16.msra.mxu1 %v536_v14 }
  0x1f   :  { %473 = vmatprep.subr.bf16.mxu1 %v537_v15  ;;  %p581_p9 = pnand %p580_p8, %p574_p5 }
  0x20   :  { %501 = vmatpush3.bf16.msra.mxu0 %v547_v26 }
  0x21   :  { %502 = vmatprep.subr.bf16.mxu0 %v601_v24 }
  0x22   :  { %474 = vmatpush3.bf16.msra.mxu1 %v538_v16 }
  0x23   :  { %475 = vmatprep.subr.bf16.mxu1 %v539_v17 }
  0x24   :  { %503 = vmatpush3.bf16.msra.mxu0 %v548_v27 }
  0x25   :  { %504 = vmatprep.subr.bf16.mxu0 %v601_v24 }
  0x26   :  { %476 = vmatpush3.bf16.msra.mxu1 %v540_v18 }
  0x27   :  { %477 = vmatprep.subr.bf16.mxu1 %v541_v19 }
  0x28   :  { %505 = vmatpush3.bf16.msra.mxu0 %v549_v28 }
  0x29   :  { %506 = vmatprep.subr.bf16.mxu0 %v601_v24 }
  0x2a   :  { %478 = vmatpush3.bf16.msra.mxu1 %v542_v20 }
  0x2b   :  { %479 = vmatprep.subr.bf16.mxu1 %v543_v21 }
  0x2c   :  { %507 = vmatpush3.bf16.msra.mxu0 %v550_v46 }
  0x2d   :  { %508 = vmatprep.subr.bf16.mxu0 %v601_v24 }
  0x2e   :  { %480 = vmatpush3.bf16.msra.mxu1 %v544_v22 }
  0x30   :  { %509 = vmatpush3.bf16.msra.mxu0 %v551_v47 }
  0x31   :  { %510 = vmatprep.subr.bf16.mxu0 %v601_v24 }
  0x34   :  { %511 = vmatpush3.bf16.msra.mxu0 %v552_v48 }
  0xd7   :  { %v118_v36 = vpop.f32.mrf.mxu0 }
  0xd8   :  { %v119_v37 = vadd.f32 %v118_v36, %v53_v34 }
  0xd9   :  { %v120_v38 = vpop.f32.mrf.mxu0 }
  0xda   :  { %v121_v39 = vadd.f32 %v120_v38, %v57_v35  ;;  %v125_v40 = vmax.f32 %v119_v37, 0.0 }
  0xdb   :  { %v122_v41 = vpop.f32.mrf.mxu0 }
  0xdc   :  { %v126_v42 = vmax.f32 %v121_v39, 0.0  ;;  %v127_v45 = vpack.c.bf16 %v125_v40, %v125_v40 }
  0xdd   :  { %v123_v43 = vpop.f32.mrf.mxu0 }
  0xde   :  { %v128_v44 = vpack.c.bf16 %v126_v42, %v126_v42 }
  0xe0   :  { %296 = vmatprep.mubr.bf16.mxu1 %v128_v44 }
  0xe1   :  { %297 = vmatmul.mubr.bf16.vlgmr.msra.gmra.mxu1 %v127_v45 }
 0x1a1   :  { %v481_v49 = vpop.f32.mrf.mxu1 }
 0x1a3   :  { %v482_v51 = vpop.f32.mrf.mxu1 }
 0x1a4   :  { %v483_v52 = vadd.f32 %v482_v51, %v481_v49 }
 0x1a5   :  { %v484_v53 = vpop.f32.mrf.mxu1 }
 0x1a6   :  { %v299_v54 = vadd.f32 %v483_v52, %v439_v50 }
 0x1a7   :  { %v485_v55 = vpop.f32.mrf.mxu1 }
 0x1a8   :  { %v304_v56 = vmax.f32 %v299_v54, 0.0 }
 0x1aa   :  { %v305_v57 = vpack.c.bf16 %v304_v56, %v304_v56 }
 0x1ac   :  { %513 = vmatmul.mubr.bf16.vlgmr.msra.gmra.mxu0 %v305_v57 }
 0x26c   :  { %v411_v59 = vpop.f32.mrf.mxu0 }
 0x26d   :  { %v412_v60 = vadd.f32 %v456_v58, %v411_v59 }
 0x26e   :  { %v514_v61 = vpop.f32.mrf.mxu0 }
 0x26f   :  { %v417_v62 = vpack.c.bf16 %v412_v60, %v412_v60 }
 0x270   :  { %v414_v63 = vpop.f32.mrf.mxu0 }
 0x271   :  { %418 = vst [vmem:[#allocation5] sm:$0xf] %v417_v62 }
 0x272   :  { %v515_v0 = vpop.f32.mrf.mxu0 }
 0x273   :  { %584 = shalt.err (!%p581_p9)
}
 0x274   :  { %428 = dma.vmem_to_hbm [thread:$0]  %s426_s13, 64, %s705_s7, [#allocation4]  }
 0x275   :  { %595 = dma.done.wait [#allocation4], 64  }
 0x276   :  { %596 = vsyncadd [#allocation4], 4294967232 }
 0x277   :  { %432 = vsyncpa [#allocation3], 1 }
 0x278   :  { %433 = vsyncpa [#allocation4], 1 }

</bundles_post_ra>
